<compile_context>
chip_gen: v6e
topology: v6e:2x2x1
jax: 0.10.0
libtpu: 0.0.40
codegen_flags: <defaults>
</compile_context>

<pallas_src>
import functools

import jax
import jax.numpy as jnp
from jax.experimental import pallas as pl
from jax.experimental.pallas import tpu as pltpu


_UNROLL_THRESHOLD = 32  # statically unroll the objective loop up to this many objectives


def _cheby_kernel(y_ref, wt_ref, rt_ref, o_ref, *, invert, clip, use_min,
                  num_obj, compute_dtype):
    """Computes one (L, TP) output tile, L = num_weights * num_ref, TP = points tile.

    y_ref:  (M, TP)    objective vectors, transposed (objectives on sublanes,
                       num_points on lanes)
    wt_ref: (M, L, 1)  wt[m, w*R + r, 0] = sign_out * weights[w, m]
    rt_ref: (M, L, 1)  rt[m, w*R + r, 0] = ref_points[r, m]
    o_ref:  (L, TP)    scalarized output (lane-dense store)
    """
    combine = jnp.minimum if use_min else jnp.maximum

    def step(m, acc):
        y_m = y_ref[pl.ds(m, 1), :].astype(compute_dtype)   # (1, TP) sublane slice
        wt_m = wt_ref[m]                                    # (L, 1)
        rt_m = rt_ref[m]                                    # (L, 1)
        # sign_resid * (ref - y): the sign is just the subtraction order.
        diff = (y_m - rt_m) if invert else (rt_m - y_m)     # (L, TP)
        if clip:
            diff = jnp.maximum(diff, 0.0)
        term = wt_m * diff                                  # (L, TP); sign_out folded in wt
        return term if acc is None else combine(acc, term)

    if num_obj <= _UNROLL_THRESHOLD:
        acc = None
        for m in range(num_obj):
            acc = step(m, acc)
    else:
        # Large M: a visible loop keeps code size and vreg live ranges bounded.
        L, TP = o_ref.shape
        init = jnp.full((L, TP), jnp.inf if use_min else -jnp.inf, compute_dtype)
        acc = jax.lax.fori_loop(0, num_obj, step, init, unroll=4)

    o_ref[...] = acc.astype(o_ref.dtype)


@functools.partial(
    jax.jit,
    static_argnames=("invert", "pseudo", "clip", "negate", "max_tile_p",
                     "compute_dtype"))
def chebyshev_scalarization(Y, weights, ref_points, *, invert=False, pseudo=False,
                            clip=False, negate=True, max_tile_p=2048,
                            compute_dtype=jnp.float32):
    """Y: (*batch, P, M); weights: (W, M); ref_points: (R, M) -> (*batch, P, W*R)."""
    *batch, P, M = Y.shape
    W, Mw = weights.shape
    R, Mr = ref_points.shape
    assert M == Mw == Mr and M >= 1 and P >= 1
    L = W * R
    cdt = compute_dtype

    B = 1
    for d in batch:
        B *= d
    # Lane-dense input layout: num_points on the last (lane) axis.
    Yt = jnp.swapaxes(Y.reshape(B, P, M), 1, 2)                  # (B, M, P)

    # Parameter tables in the transposed layout; sign_out folded into the weights.
    # -max(x) == min(-x): folding sign_out flips the reduction direction.
    sign_out = -1.0 if negate else 1.0
    use_min = bool(pseudo) != bool(negate)
    Wt = sign_out * jnp.repeat(weights.astype(cdt), R, axis=0)   # (L, M), row w*R+r
    Rt = jnp.tile(ref_points.astype(cdt), (W, 1))                # (L, M), row w*R+r
    Wt = jnp.swapaxes(Wt, 0, 1)[:, :, None]                      # (M, L, 1)
    Rt = jnp.swapaxes(Rt, 0, 1)[:, :, None]                      # (M, L, 1)

    # Tile num_points with large lane-aligned tiles; a ragged last tile is masked by
    # Pallas (no full-array jnp.pad copy of Y).
    LANE = 128
    max_tile_p = max(LANE, (int(max_tile_p) // LANE) * LANE)
    if P <= LANE:
        TP = P                                    # full-dim block (always legal)
    else:
        TP = min(max_tile_p, (P // LANE) * LANE)
    n_p = pl.cdiv(P, TP)
    # v7x megacore: make sure both TensorCores get at least one grid point.
    if B * n_p < 2 and P >= 2 * LANE:
        TP = max(LANE, ((P // 2) // LANE) * LANE)
        n_p = pl.cdiv(P, TP)

    kernel = functools.partial(_cheby_kernel, invert=invert, clip=clip,
                               use_min=use_min, num_obj=M, compute_dtype=cdt)

    out = pl.pallas_call(
        kernel,
        out_shape=jax.ShapeDtypeStruct((B, L, P), Y.dtype),
        grid_spec=pltpu.PrefetchScalarGridSpec(
            num_scalar_prefetch=0,
            grid=(B, n_p),
            in_specs=[
                pl.BlockSpec((pl.Squeezed(), M, TP), lambda b, p: (b, 0, p)),
                pl.BlockSpec((M, L, 1), lambda b, p: (0, 0, 0)),   # VMEM-resident table
                pl.BlockSpec((M, L, 1), lambda b, p: (0, 0, 0)),   # VMEM-resident table
            ],
            out_specs=pl.BlockSpec((pl.Squeezed(), L, TP), lambda b, p: (b, 0, p)),
        ),
        compiler_params=pltpu.CompilerParams(
            dimension_semantics=("parallel", "parallel")),
    )(Yt, Wt, Rt)                                                 # (B, L, P)

    # Back to the module's (..., num_points, num_scalars) layout.
    return jnp.swapaxes(out, 1, 2).reshape(*batch, P, L)


def _reference(Y, weights, ref_points, *, invert=False, pseudo=False,
               clip=False, negate=True):
    sign_resid = -1.0 if invert else 1.0
    sign_out = -1.0 if negate else 1.0
    diff = sign_resid * (ref_points[None, None, :, :] - Y[:, :, None, :])    # (B,P,R,M)
    if clip:
        diff = jnp.maximum(diff, 0.0)
    weighted = weights[None, None, :, None, :] * diff[:, :, None, :, :]      # (B,P,W,R,M)
    red = jnp.min(weighted, axis=-1) if pseudo else jnp.max(weighted, axis=-1)
    out = sign_out * red                                                     # (B,P,W,R)
    B, P, W, R = out.shape
    return out.reshape(B, P, W * R)


if __name__ == "__main__":
    key = jax.random.PRNGKey(0)
    k1, k2, k3 = jax.random.split(key, 3)

    # Main case: P not a multiple of the 128-lane tile -> exercises the ragged last
    # tile (masked) instead of a padded copy of Y.
    B, P, M = 2, 200, 8          # batch, num_points, num_objectives
    W, R = 4, 2                  # num_weights, num_ref

    Y = jax.random.normal(k1, (B, P, M), dtype=jnp.float32)
    weights = jnp.abs(jax.random.normal(k2, (W, M), dtype=jnp.float32))
    ref_points = jax.random.normal(k3, (R, M), dtype=jnp.float32)

    configs = [
        dict(invert=False, pseudo=False, clip=False, negate=True),   # default
        dict(invert=True,  pseudo=True,  clip=True,  negate=False),
        dict(invert=True,  pseudo=False, clip=True,  negate=True),
        dict(invert=False, pseudo=True,  clip=False, negate=False),
    ]
    for cfg in configs:
        out = jax.block_until_ready(
            chebyshev_scalarization(Y, weights, ref_points, **cfg))
        ref = _reference(Y, weights, ref_points, **cfg)
        assert out.shape == (B, P, W * R), out.shape
        assert jnp.allclose(out, ref, atol=1e-5, rtol=1e-5), (
            cfg, float(jnp.max(jnp.abs(out - ref))))

    # Small num_points (< one lane tile): full-dim block path.
    P2 = 20
    Y2 = jax.random.normal(k1, (B, P2, M), dtype=jnp.float32)
    out2 = jax.block_until_ready(chebyshev_scalarization(Y2, weights, ref_points))
    ref2 = _reference(Y2, weights, ref_points)
    assert out2.shape == (B, P2, W * R), out2.shape
    assert jnp.allclose(out2, ref2, atol=1e-5, rtol=1e-5)

    # Many objectives: exercises the fori_loop (non-unrolled) path.
    M3, W3, R3, P3 = 40, 2, 3, 256
    Y3 = jax.random.normal(k1, (B, P3, M3), dtype=jnp.float32)
    w3 = jnp.abs(jax.random.normal(k2, (W3, M3), dtype=jnp.float32))
    r3 = jax.random.normal(k3, (R3, M3), dtype=jnp.float32)
    out3 = jax.block_until_ready(chebyshev_scalarization(Y3, w3, r3, clip=True))
    ref3 = _reference(Y3, w3, r3, clip=True)
    assert out3.shape == (B, P3, W3 * R3), out3.shape
    assert jnp.allclose(out3, ref3, atol=1e-5, rtol=1e-5)

    print("KERNEL_OK")
</pallas_src>

<mosaic_0001>
module attributes {stable_mosaic.version = 11 : i64} {
  func.func @_cheby_kernel(%arg0: i32, %arg1: i32, %arg2: memref<1x8x128xf32, #tpu.memory_space<vmem>>, %arg3: memref<8x8x1xf32, #tpu.memory_space<vmem>>, %arg4: memref<8x8x1xf32, #tpu.memory_space<vmem>>, %arg5: memref<1x8x128xf32, #tpu.memory_space<vmem>>) attributes {dimension_semantics = [#tpu.dimension_semantics<parallel>, #tpu.dimension_semantics<parallel>], iteration_bounds = array<i64: 2, 2>, scalar_prefetch = 0 : i64, scratch_operands = 0 : i64, tpu.core_type = #tpu.core_type<tc>, window_params = [{transform_indices = @transform_0, window_bounds = array<i64: 1, 8, 128>}, {pipeline_mode = #tpu.pipeline_mode<synchronous>, transform_indices = @transform_1, window_bounds = array<i64: 8, 8, 1>}, {pipeline_mode = #tpu.pipeline_mode<synchronous>, transform_indices = @transform_2, window_bounds = array<i64: 8, 8, 1>}, {transform_indices = @transform_3, window_bounds = array<i64: 1, 8, 128>}]} {
    %c0 = arith.constant 0 : index
    %c0_0 = arith.constant 0 : index
    %c0_1 = arith.constant 0 : index
    %0 = vector.load %arg2[%c0, %c0_0, %c0_1] : memref<1x8x128xf32, #tpu.memory_space<vmem>>, vector<1x1x128xf32>
    %1 = vector.shape_cast %0 : vector<1x1x128xf32> to vector<1x128xf32>
    %c0_2 = arith.constant 0 : index
    %c0_3 = arith.constant 0 : index
    %c0_4 = arith.constant 0 : index
    %2 = vector.load %arg3[%c0_2, %c0_3, %c0_4] : memref<8x8x1xf32, #tpu.memory_space<vmem>>, vector<1x8x1xf32>
    %3 = vector.shape_cast %2 : vector<1x8x1xf32> to vector<8x1xf32>
    %c0_5 = arith.constant 0 : index
    %c0_6 = arith.constant 0 : index
    %c0_7 = arith.constant 0 : index
    %4 = vector.load %arg4[%c0_5, %c0_6, %c0_7] : memref<8x8x1xf32, #tpu.memory_space<vmem>>, vector<1x8x1xf32>
    %5 = vector.shape_cast %4 : vector<1x8x1xf32> to vector<8x1xf32>
    %6 = vector.broadcast %5 : vector<8x1xf32> to vector<8x128xf32>
    %7 = vector.broadcast %1 : vector<1x128xf32> to vector<8x128xf32>
    %8 = arith.subf %6, %7 : vector<8x128xf32>
    %9 = vector.broadcast %3 : vector<8x1xf32> to vector<8x128xf32>
    %10 = arith.mulf %9, %8 : vector<8x128xf32>
    %c0_8 = arith.constant 0 : index
    %c1 = arith.constant 1 : index
    %c0_9 = arith.constant 0 : index
    %11 = vector.load %arg2[%c0_8, %c1, %c0_9] : memref<1x8x128xf32, #tpu.memory_space<vmem>>, vector<1x1x128xf32>
    %12 = vector.shape_cast %11 : vector<1x1x128xf32> to vector<1x128xf32>
    %c1_10 = arith.constant 1 : index
    %c0_11 = arith.constant 0 : index
    %c0_12 = arith.constant 0 : index
    %13 = vector.load %arg3[%c1_10, %c0_11, %c0_12] : memref<8x8x1xf32, #tpu.memory_space<vmem>>, vector<1x8x1xf32>
    %14 = vector.shape_cast %13 : vector<1x8x1xf32> to vector<8x1xf32>
    %c1_13 = arith.constant 1 : index
    %c0_14 = arith.constant 0 : index
    %c0_15 = arith.constant 0 : index
    %15 = vector.load %arg4[%c1_13, %c0_14, %c0_15] : memref<8x8x1xf32, #tpu.memory_space<vmem>>, vector<1x8x1xf32>
    %16 = vector.shape_cast %15 : vector<1x8x1xf32> to vector<8x1xf32>
    %17 = vector.broadcast %16 : vector<8x1xf32> to vector<8x128xf32>
    %18 = vector.broadcast %12 : vector<1x128xf32> to vector<8x128xf32>
    %19 = arith.subf %17, %18 : vector<8x128xf32>
    %20 = vector.broadcast %14 : vector<8x1xf32> to vector<8x128xf32>
    %21 = arith.mulf %20, %19 : vector<8x128xf32>
    %22 = arith.minimumf %10, %21 : vector<8x128xf32>
    %c0_16 = arith.constant 0 : index
    %c2 = arith.constant 2 : index
    %c0_17 = arith.constant 0 : index
    %23 = vector.load %arg2[%c0_16, %c2, %c0_17] : memref<1x8x128xf32, #tpu.memory_space<vmem>>, vector<1x1x128xf32>
    %24 = vector.shape_cast %23 : vector<1x1x128xf32> to vector<1x128xf32>
    %c2_18 = arith.constant 2 : index
    %c0_19 = arith.constant 0 : index
    %c0_20 = arith.constant 0 : index
    %25 = vector.load %arg3[%c2_18, %c0_19, %c0_20] : memref<8x8x1xf32, #tpu.memory_space<vmem>>, vector<1x8x1xf32>
    %26 = vector.shape_cast %25 : vector<1x8x1xf32> to vector<8x1xf32>
    %c2_21 = arith.constant 2 : index
    %c0_22 = arith.constant 0 : index
    %c0_23 = arith.constant 0 : index
    %27 = vector.load %arg4[%c2_21, %c0_22, %c0_23] : memref<8x8x1xf32, #tpu.memory_space<vmem>>, vector<1x8x1xf32>
    %28 = vector.shape_cast %27 : vector<1x8x1xf32> to vector<8x1xf32>
    %29 = vector.broadcast %28 : vector<8x1xf32> to vector<8x128xf32>
    %30 = vector.broadcast %24 : vector<1x128xf32> to vector<8x128xf32>
    %31 = arith.subf %29, %30 : vector<8x128xf32>
    %32 = vector.broadcast %26 : vector<8x1xf32> to vector<8x128xf32>
    %33 = arith.mulf %32, %31 : vector<8x128xf32>
    %34 = arith.minimumf %22, %33 : vector<8x128xf32>
    %c0_24 = arith.constant 0 : index
    %c3 = arith.constant 3 : index
    %c0_25 = arith.constant 0 : index
    %35 = vector.load %arg2[%c0_24, %c3, %c0_25] : memref<1x8x128xf32, #tpu.memory_space<vmem>>, vector<1x1x128xf32>
    %36 = vector.shape_cast %35 : vector<1x1x128xf32> to vector<1x128xf32>
    %c3_26 = arith.constant 3 : index
    %c0_27 = arith.constant 0 : index
    %c0_28 = arith.constant 0 : index
    %37 = vector.load %arg3[%c3_26, %c0_27, %c0_28] : memref<8x8x1xf32, #tpu.memory_space<vmem>>, vector<1x8x1xf32>
    %38 = vector.shape_cast %37 : vector<1x8x1xf32> to vector<8x1xf32>
    %c3_29 = arith.constant 3 : index
    %c0_30 = arith.constant 0 : index
    %c0_31 = arith.constant 0 : index
    %39 = vector.load %arg4[%c3_29, %c0_30, %c0_31] : memref<8x8x1xf32, #tpu.memory_space<vmem>>, vector<1x8x1xf32>
    %40 = vector.shape_cast %39 : vector<1x8x1xf32> to vector<8x1xf32>
    %41 = vector.broadcast %40 : vector<8x1xf32> to vector<8x128xf32>
    %42 = vector.broadcast %36 : vector<1x128xf32> to vector<8x128xf32>
    %43 = arith.subf %41, %42 : vector<8x128xf32>
    %44 = vector.broadcast %38 : vector<8x1xf32> to vector<8x128xf32>
    %45 = arith.mulf %44, %43 : vector<8x128xf32>
    %46 = arith.minimumf %34, %45 : vector<8x128xf32>
    %c0_32 = arith.constant 0 : index
    %c4 = arith.constant 4 : index
    %c0_33 = arith.constant 0 : index
    %47 = vector.load %arg2[%c0_32, %c4, %c0_33] : memref<1x8x128xf32, #tpu.memory_space<vmem>>, vector<1x1x128xf32>
    %48 = vector.shape_cast %47 : vector<1x1x128xf32> to vector<1x128xf32>
    %c4_34 = arith.constant 4 : index
    %c0_35 = arith.constant 0 : index
    %c0_36 = arith.constant 0 : index
    %49 = vector.load %arg3[%c4_34, %c0_35, %c0_36] : memref<8x8x1xf32, #tpu.memory_space<vmem>>, vector<1x8x1xf32>
    %50 = vector.shape_cast %49 : vector<1x8x1xf32> to vector<8x1xf32>
    %c4_37 = arith.constant 4 : index
    %c0_38 = arith.constant 0 : index
    %c0_39 = arith.constant 0 : index
    %51 = vector.load %arg4[%c4_37, %c0_38, %c0_39] : memref<8x8x1xf32, #tpu.memory_space<vmem>>, vector<1x8x1xf32>
    %52 = vector.shape_cast %51 : vector<1x8x1xf32> to vector<8x1xf32>
    %53 = vector.broadcast %52 : vector<8x1xf32> to vector<8x128xf32>
    %54 = vector.broadcast %48 : vector<1x128xf32> to vector<8x128xf32>
    %55 = arith.subf %53, %54 : vector<8x128xf32>
    %56 = vector.broadcast %50 : vector<8x1xf32> to vector<8x128xf32>
    %57 = arith.mulf %56, %55 : vector<8x128xf32>
    %58 = arith.minimumf %46, %57 : vector<8x128xf32>
    %c0_40 = arith.constant 0 : index
    %c5 = arith.constant 5 : index
    %c0_41 = arith.constant 0 : index
    %59 = vector.load %arg2[%c0_40, %c5, %c0_41] : memref<1x8x128xf32, #tpu.memory_space<vmem>>, vector<1x1x128xf32>
    %60 = vector.shape_cast %59 : vector<1x1x128xf32> to vector<1x128xf32>
    %c5_42 = arith.constant 5 : index
    %c0_43 = arith.constant 0 : index
    %c0_44 = arith.constant 0 : index
    %61 = vector.load %arg3[%c5_42, %c0_43, %c0_44] : memref<8x8x1xf32, #tpu.memory_space<vmem>>, vector<1x8x1xf32>
    %62 = vector.shape_cast %61 : vector<1x8x1xf32> to vector<8x1xf32>
    %c5_45 = arith.constant 5 : index
    %c0_46 = arith.constant 0 : index
    %c0_47 = arith.constant 0 : index
    %63 = vector.load %arg4[%c5_45, %c0_46, %c0_47] : memref<8x8x1xf32, #tpu.memory_space<vmem>>, vector<1x8x1xf32>
    %64 = vector.shape_cast %63 : vector<1x8x1xf32> to vector<8x1xf32>
    %65 = vector.broadcast %64 : vector<8x1xf32> to vector<8x128xf32>
    %66 = vector.broadcast %60 : vector<1x128xf32> to vector<8x128xf32>
    %67 = arith.subf %65, %66 : vector<8x128xf32>
    %68 = vector.broadcast %62 : vector<8x1xf32> to vector<8x128xf32>
    %69 = arith.mulf %68, %67 : vector<8x128xf32>
    %70 = arith.minimumf %58, %69 : vector<8x128xf32>
    %c0_48 = arith.constant 0 : index
    %c6 = arith.constant 6 : index
    %c0_49 = arith.constant 0 : index
    %71 = vector.load %arg2[%c0_48, %c6, %c0_49] : memref<1x8x128xf32, #tpu.memory_space<vmem>>, vector<1x1x128xf32>
    %72 = vector.shape_cast %71 : vector<1x1x128xf32> to vector<1x128xf32>
    %c6_50 = arith.constant 6 : index
    %c0_51 = arith.constant 0 : index
    %c0_52 = arith.constant 0 : index
    %73 = vector.load %arg3[%c6_50, %c0_51, %c0_52] : memref<8x8x1xf32, #tpu.memory_space<vmem>>, vector<1x8x1xf32>
    %74 = vector.shape_cast %73 : vector<1x8x1xf32> to vector<8x1xf32>
    %c6_53 = arith.constant 6 : index
    %c0_54 = arith.constant 0 : index
    %c0_55 = arith.constant 0 : index
    %75 = vector.load %arg4[%c6_53, %c0_54, %c0_55] : memref<8x8x1xf32, #tpu.memory_space<vmem>>, vector<1x8x1xf32>
    %76 = vector.shape_cast %75 : vector<1x8x1xf32> to vector<8x1xf32>
    %77 = vector.broadcast %76 : vector<8x1xf32> to vector<8x128xf32>
    %78 = vector.broadcast %72 : vector<1x128xf32> to vector<8x128xf32>
    %79 = arith.subf %77, %78 : vector<8x128xf32>
    %80 = vector.broadcast %74 : vector<8x1xf32> to vector<8x128xf32>
    %81 = arith.mulf %80, %79 : vector<8x128xf32>
    %82 = arith.minimumf %70, %81 : vector<8x128xf32>
    %c0_56 = arith.constant 0 : index
    %c7 = arith.constant 7 : index
    %c0_57 = arith.constant 0 : index
    %83 = vector.load %arg2[%c0_56, %c7, %c0_57] : memref<1x8x128xf32, #tpu.memory_space<vmem>>, vector<1x1x128xf32>
    %84 = vector.shape_cast %83 : vector<1x1x128xf32> to vector<1x128xf32>
    %c7_58 = arith.constant 7 : index
    %c0_59 = arith.constant 0 : index
    %c0_60 = arith.constant 0 : index
    %85 = vector.load %arg3[%c7_58, %c0_59, %c0_60] : memref<8x8x1xf32, #tpu.memory_space<vmem>>, vector<1x8x1xf32>
    %86 = vector.shape_cast %85 : vector<1x8x1xf32> to vector<8x1xf32>
    %c7_61 = arith.constant 7 : index
    %c0_62 = arith.constant 0 : index
    %c0_63 = arith.constant 0 : index
    %87 = vector.load %arg4[%c7_61, %c0_62, %c0_63] : memref<8x8x1xf32, #tpu.memory_space<vmem>>, vector<1x8x1xf32>
    %88 = vector.shape_cast %87 : vector<1x8x1xf32> to vector<8x1xf32>
    %89 = vector.broadcast %88 : vector<8x1xf32> to vector<8x128xf32>
    %90 = vector.broadcast %84 : vector<1x128xf32> to vector<8x128xf32>
    %91 = arith.subf %89, %90 : vector<8x128xf32>
    %92 = vector.broadcast %86 : vector<8x1xf32> to vector<8x128xf32>
    %93 = arith.mulf %92, %91 : vector<8x128xf32>
    %94 = arith.minimumf %82, %93 : vector<8x128xf32>
    %c0_64 = arith.constant 0 : index
    %c0_65 = arith.constant 0 : index
    %c0_66 = arith.constant 0 : index
    %95 = vector.load %arg5[%c0_64, %c0_65, %c0_66] : memref<1x8x128xf32, #tpu.memory_space<vmem>>, vector<1x8x128xf32>
    %96 = vector.shape_cast %95 : vector<1x8x128xf32> to vector<8x128xf32>
    %97 = vector.shape_cast %94 : vector<8x128xf32> to vector<1x8x128xf32>
    tpu.vector_store %arg5[%c0_64, %c0_65, %c0_66], %97 {strides = array<i32>} : memref<1x8x128xf32, #tpu.memory_space<vmem>>, vector<1x8x128xf32>,
    return
  }
  func.func @transform_0(%arg0: i32, %arg1: i32) -> (i32, i32, i32) {
    %c0_i32 = arith.constant 0 : i32
    %c0_i32_0 = arith.constant 0 : i32
    return %arg0, %c0_i32, %arg1 : i32, i32, i32
  }
  func.func @transform_1(%arg0: i32, %arg1: i32) -> (i32, i32, i32) {
    %c0_i32 = arith.constant 0 : i32
    %c0_i32_0 = arith.constant 0 : i32
    %c0_i32_1 = arith.constant 0 : i32
    %c0_i32_2 = arith.constant 0 : i32
    return %c0_i32, %c0_i32_0, %c0_i32_1 : i32, i32, i32
  }
  func.func @transform_2(%arg0: i32, %arg1: i32) -> (i32, i32, i32) {
    %c0_i32 = arith.constant 0 : i32
    %c0_i32_0 = arith.constant 0 : i32
    %c0_i32_1 = arith.constant 0 : i32
    %c0_i32_2 = arith.constant 0 : i32
    return %c0_i32, %c0_i32_0, %c0_i32_1 : i32, i32, i32
  }
  func.func @transform_3(%arg0: i32, %arg1: i32) -> (i32, i32, i32) {
    %c0_i32 = arith.constant 0 : i32
    %c0_i32_0 = arith.constant 0 : i32
    return %arg0, %c0_i32, %arg1 : i32, i32, i32
  }
}

</mosaic_0001>

<bundles_post_ra>
// kernel: chebyshev_scalarization.1
= control target key start
LH: loop header
LB: loop body
LE: loop exit
PB: predicated region body
PF: predicated region fallthrough
CT: control target
= control target key end

     0   :  { %8 = vsyncpa [#allocation3], 0  ;;  %s869_s0 = inlined_call_operand.vmem [shape: f32[2,8,200], index: 0, kind: input, shape index: {}]   ;;  %s870_s1 = inlined_call_operand.vmem [shape: f32[8,8,1], index: 1, kind: input, shape index: {}]   ;;  %s871_s2 = inlined_call_operand.vmem [shape: f32[8,8,1], index: 2, kind: input, shape index: {}]   ;;  %s872_s3 = inlined_call_operand.hbm [shape: f32[2,8,200], index: 3, kind: output, shape index: {}]  }
   0x1   :  { %10 = vsyncpa [#allocation3 + $0x1], 0  ;;  %s687_s12 = smov 0   ;;  %s689_s13 = smov 0  }
   0x2   :  { %s691_s14 = smov 0   ;;  %s693_s15 = smov 0  }
   0x3   :  { %s695_s16 = smov 0   ;;  %s697_s17 = smov 0  }
   0x4   :  { %s699_s18 = smov 0   ;;  %s701_s19 = smov 0  }
   0x5 LB: > { %s462_s20 = sadd.s32 4294967295, %s663_s19   ;;  %s463_s21 = sadd.s32 4294967294, %s663_s19   ;;  %s663_s19 = sphi %s701_s19, %s16_s19   ;;  %s659_s18 = sphi %s699_s18, %s881_s18   ;;  %s655_s17 = sphi %s697_s17, %s880_s17   ;;  %s651_s16 = sphi %s695_s16, %s879_s16   ;;  %s647_s15 = sphi %s693_s15, %s878_s15   ;;  %s643_s14 = sphi %s691_s14, %s877_s14   ;;  %s639_s13 = sphi %s689_s13, %s876_s13   ;;  %s635_s12 = sphi %s687_s12, %s875_s12  }
   0x6   : > { %s25_s22 = sadd.s32 1, %s655_s17  ;;  %s28_s23 = sadd.s32 1, %s659_s18 }
   0x7   : > { %p26_p0 = scmp.ge.s32.totalorder %s25_s22, 2  ;;  %p117_p1 = scmp.ne.s32.totalorder %s643_s14, %s639_s13 }
   0x8   : > { %p118_p2 = scmp.eq.s32.totalorder %s462_s20, 3  ;;  %p123_p5 = scmp.ne.s32.totalorder %s639_s13, %s635_s12 }
   0x9   : > { %s883_s22 = smov (%p26_p0, %s25_s22), 0  ;;  %s885_s23 = smov (!%p26_p0, %s28_s23), %s659_s18 }
   0xa   : > { %s103_s24 = ssub.s32 %s655_s17, %s883_s22  ;;  %p738_p3 = por %p118_p2, %p117_p1 }
   0xb   : > { %p30_p4 = scmp.ge.s32.totalorder %s885_s23, 2  ;;  %p124_p6 = scmp.eq.s32.totalorder %s463_s21, 3 }
   0xc   : > { %p466_p7 = scmp.ge.s32.totalorder %s663_s19, 1  ;;  %p159_p9 = scmp.lt.s32.totalorder %s663_s19, 5 }
   0xd   : > { %s887_s23 = smov (%p30_p4, %s885_s23), 0  ;;  %p747_p8 = por %p124_p6, %p123_p5 }
   0xe   : > { %s102_s27 = ssub.s32 %s659_s18, %s887_s23  ;;  %s107_s28 = sadd.s32 1, %s643_s14 }
   0xf   : > { %s104_s29 = sor.u32 %s103_s24, %s102_s27  ;;  %p160_p10 = pnand %p466_p7, %p159_p9 }
  0x10   : > { %p105_p11 = scmp.eq.s32.totalorder %s104_s29, 0  ;;  %p186_p12 = scmp.lt.s32.totalorder (!%p160_p10), %s651_s16, 1 }
  0x11   : > { %163 = sbr.rel (%p160_p10) target bundleno = 195 (0xc3), region = 32  ;;  %p188_p13 = scmp.lt.s32.totalorder (!%p160_p10), %s647_s15, 1 }
  0x12   : > { %s756_s30 = scalar_select %p105_p11, %s643_s14, %s107_s28  }
  0x13   : > { %s183_s28 = sand.u32 (!%p160_p10), 1, %s639_s13   ;;  %s493_s4 = sshll.u32 (!%p160_p10), %s651_s16, 1 }
  0x14   : > { %s467_s29 = sshll.u32 (!%p160_p10), %s183_s28, 3  ;;  %s380_s5 = sadd.s32 (!%p160_p10), %s647_s15, %s493_s4 }
  0x15   : > { %s494_s6 = sshll.u32 (!%p160_p10), %s380_s5, 7  ;;  %s185_s7 = scalar_lea.vmem (!%p160_p10), [#allocation2], %s467_s29 }
  0x16   : > { %v196_v0 = vld [vmem:[%s871_s2] sm:$0xff]  ;;  %v665_v2 = vmov 0   ;;  %v472_v3 = vld [vmem:[%s871_s2 + $0x8] sm:$0xff]  ;;  %v475_v5 = vld [vmem:[%s871_s2 + $0x10] sm:$0xff]  ;;  %s187_s8 = scalar_select %p186_p12, %s651_s16, 1 }
  0x17   : > { %v195_v1 = vld [vmem:[%s870_s1] sm:$0xff]  ;;  %570 = vset.pattern.permute.xlu1 %v665_v2  ;;  %569 = vset.pattern.permute.xlu0 %v665_v2  ;;  %v471_v4 = vld [vmem:[%s870_s1 + $0x8] sm:$0xff]  ;;  %v474_v6 = vld [vmem:[%s870_s1 + $0x10] sm:$0xff]  ;;  %s189_s9 = scalar_select %p188_p13, %s647_s15, 1 }
  0x18   : > { %199 = vperm.xlu0 %569, %v196_v0   ;;  %209 = vperm.xlu1 %570, %v195_v1   ;;  %v478_v7 = vld [vmem:[%s871_s2 + $0x18] sm:$0xff]  ;;  %v481_v9 = vld [vmem:[%s871_s2 + $0x20] sm:$0xff]  ;;  %v484_v11 = vld [vmem:[%s871_s2 + $0x28] sm:$0xff]  ;;  %s468_s10 = sshll.u32 %s187_s8, 1  ;;  %s384_s8 = sshll.u32 %s185_s7, 4  ;;  %s385_s8 = int_to_ptr.vmem [resolvable:$true] %s384_s8 }
  0x19   : > { %v477_v8 = vld [vmem:[%s870_s1 + $0x18] sm:$0xff]  ;;  %v480_v10 = vld [vmem:[%s870_s1 + $0x20] sm:$0xff]  ;;  %v483_v12 = vld [vmem:[%s870_s1 + $0x28] sm:$0xff]  ;;  %s191_s11 = sadd.s32 %s468_s10, %s189_s9  ;;  %s382_s10 = scalar_lea.hbm %s872_s3, %s494_s6 }
  0x1a   : > { %v487_v13 = vld [vmem:[%s871_s2 + $0x30] sm:$0xff]  ;;  %v490_v15 = vld [vmem:[%s871_s2 + $0x38] sm:$0xff]  ;;  %s469_s20 = sshll.u32 %s191_s11, 3  ;;  %s369_s11 = scalar_lea.sflag [#allocation3], %s183_s28 }
  0x1b   : > { %v486_v14 = vld [vmem:[%s870_s1 + $0x30] sm:$0xff]  ;;  %v489_v16 = vld [vmem:[%s870_s1 + $0x38] sm:$0xff]  ;;  %s813_s27 = scalar_lea.vmem %s869_s0, %s469_s20  ;;  %s571_s20 = scalar_lea.vmem %s385_s8, 128 }
  0x1c   : > { %220 = vperm.xlu0 %569, %v472_v3   ;;  %230 = vperm.xlu1 %570, %v471_v4   ;;  %v473_v23 = vld [vmem:[%s813_s27 + $0x1] ss:$0 sm:$0xff]  ;;  %v470_v24 = vld [vmem:[%s813_s27] ss:$0 sm:$0xff]  ;;  %v476_v25 = vld [vmem:[%s813_s27 + $0x2] ss:$0 sm:$0xff]  ;;  %p572_p0 = scmp.ne.s32.totalorder %s385_s8, %s571_s20 }
  0x1d   : > { %v479_v29 = vld [vmem:[%s813_s27 + $0x3] ss:$0 sm:$0xff]  ;;  %v482_v33 = vld [vmem:[%s813_s27 + $0x4] ss:$0 sm:$0xff]  ;;  %v485_v37 = vld [vmem:[%s813_s27 + $0x5] ss:$0 sm:$0xff] }
  0x1e   : > { %v488_v46 = vld [vmem:[%s813_s27 + $0x6] ss:$0 sm:$0xff]  ;;  %v491_v54 = vld [vmem:[%s813_s27 + $0x7] ss:$0 sm:$0xff]  ;;  %p573_p1 = pnand %p572_p0, %p738_p3  ;;  %s666_s15 = smov [#allocation2]  }
  0x1f   : > { %s575_s21 = sshll.u32 %s666_s15, 4  ;;  %s576_s21 = int_to_ptr.vmem [resolvable:$false] %s575_s21 }
  0x20   : > { %242 = vperm.xlu0 %569, %v475_v5   ;;  %252 = vperm.xlu1 %570, %v474_v6   ;;  %p574_p2 = pneg %p573_p1  ;;  %s577_s24 = scalar_lea.vmem %s576_s21, 256 }
  0x21   : > { %p578_p4 = scmp.lt.s32.totalorder %s385_s8, %s576_s21  ;;  %p579_p5 = scmp.lt.s32.totalorder %s577_s24, %s571_s20 }
  0x23   : > { %p580_p6 = por %p579_p5, %p578_p4 }
  0x24   : > { %264 = vperm.xlu0 %569, %v478_v7   ;;  %274 = vperm.xlu1 %570, %v477_v8  }
  0x25   : > { %p581_p7 = pnand %p580_p6, %p574_p2 }
  0x28   : > { %286 = vperm.xlu0 %569, %v481_v9   ;;  %296 = vperm.xlu1 %570, %v480_v10  }
  0x2c   : > { %308 = vperm.xlu0 %569, %v484_v11   ;;  %318 = vperm.xlu1 %570, %v483_v12  }
  0x30   : > { %330 = vperm.xlu0 %569, %v487_v13   ;;  %340 = vperm.xlu1 %570, %v486_v14  }
  0x34   : > { %352 = vperm.xlu0 %569, %v490_v15   ;;  %362 = vperm.xlu1 %570, %v489_v16  }
  0x93   : > { %v200_v17 = vpop.permute.xlu0 %199  ;;  %v210_v18 = vpop.permute.xlu1 %209 }
  0x94   : > { %v206_v30 = vsub.f32 %v200_v17, %v470_v24 }
  0x96   : > { %v212_v38 = vmul.f32 %v210_v18, %v206_v30 }
  0x97   : > { %v221_v19 = vpop.permute.xlu0 %220  ;;  %v231_v20 = vpop.permute.xlu1 %230 }
  0x98   : > { %v227_v28 = vsub.f32 %v221_v19, %v473_v23 }
  0x9a   : > { %v233_v35 = vmul.f32 %v231_v20, %v227_v28 }
  0x9b   : > { %v243_v21 = vpop.permute.xlu0 %242  ;;  %v253_v22 = vpop.permute.xlu1 %252 }
  0x9c   : > { %v249_v31 = vsub.f32 %v243_v21, %v476_v25  ;;  %v234_v43 = vmin.f32 %v212_v38, %v233_v35 }
  0x9e   : > { %v255_v39 = vmul.f32 %v253_v22, %v249_v31 }
  0x9f   : > { %v265_v26 = vpop.permute.xlu0 %264  ;;  %v275_v27 = vpop.permute.xlu1 %274 }
  0xa0   : > { %v271_v36 = vsub.f32 %v265_v26, %v479_v29  ;;  %v256_v47 = vmin.f32 %v234_v43, %v255_v39 }
  0xa2   : > { %v277_v44 = vmul.f32 %v275_v27, %v271_v36 }
  0xa3   : > { %v287_v32 = vpop.permute.xlu0 %286  ;;  %v297_v34 = vpop.permute.xlu1 %296 }
  0xa4   : > { %v293_v40 = vsub.f32 %v287_v32, %v482_v33  ;;  %v278_v51 = vmin.f32 %v256_v47, %v277_v44 }
  0xa6   : > { %v299_v48 = vmul.f32 %v297_v34, %v293_v40 }
  0xa7   : > { %v309_v41 = vpop.permute.xlu0 %308  ;;  %v319_v42 = vpop.permute.xlu1 %318 }
  0xa8   : > { %v315_v45 = vsub.f32 %v309_v41, %v485_v37  ;;  %v300_v55 = vmin.f32 %v278_v51, %v299_v48 }
  0xaa   : > { %v321_v52 = vmul.f32 %v319_v42, %v315_v45 }
  0xab   : > { %v331_v49 = vpop.permute.xlu0 %330  ;;  %v341_v50 = vpop.permute.xlu1 %340 }
  0xac   : > { %v337_v53 = vsub.f32 %v331_v49, %v488_v46  ;;  %v322_v58 = vmin.f32 %v300_v55, %v321_v52 }
  0xae   : > { %v343_v56 = vmul.f32 %v341_v50, %v337_v53 }
  0xaf   : > { %v353_v57 = vpop.permute.xlu0 %352  ;;  %v363_v60 = vpop.permute.xlu1 %362 }
  0xb0   : > { %v359_v59 = vsub.f32 %v353_v57, %v491_v54  ;;  %v344_v61 = vmin.f32 %v322_v58, %v343_v56 }
  0xb2   : > { %v365_v62 = vmul.f32 %v363_v60, %v359_v59 }
  0xb4   : > { %v366_v63 = vmin.f32 %v344_v61, %v365_v62 }
  0xb6   : > { %367 = vst [vmem:[%s185_s7] sm:$0xff] %v366_v63 }
  0xb7   : > { %584 = shalt.err (!%p581_p7)
}
  0xb8   : > { %s585_s27 = scalar_lea.hbm %s382_s10, 128  ;;  %s589_s4 = scalar_lea.hbm %s872_s3, 512 }
  0xb9   : > { %p586_p9 = scmp.ne.s32.totalorder %s382_s10, %s585_s27  ;;  %p590_p12 = scmp.lt.s32.totalorder %s382_s10, %s872_s3 }
  0xba   : > { %p591_p13 = scmp.lt.s32.totalorder %s589_s4, %s585_s27 }
  0xbb   : > { %p587_p10 = pnand %p586_p9, %p738_p3 }
  0xbc   : > { %p592_p0 = por %p591_p13, %p590_p12 }
  0xbd   : > { %p588_p11 = pneg %p587_p10 }
  0xbf   : > { %p593_p1 = pnand %p592_p0, %p588_p11 }
  0xc1   : > { %596 = shalt.err (!%p593_p1)
}
  0xc2   : > { %497 = dma.vmem_to_hbm [thread:$0]  (%p738_p3), %s385_s8, 128, %s382_s10, %s369_s11  }
  0xc3 PF: > { %p503_p2 = scmp.ge.s32.totalorder %s663_s19, 2  ;;  %s396_s7 = sand.u32 1, %s635_s12  }
  0xc4   : > { %s397_s9 = scalar_lea.sflag [#allocation3], %s396_s7 }
  0xc5   : > { %p500_p4 = pnand %p503_p2, %p747_p8 }
  0xc7   : > { %p501_p5 = pneg %p500_p4 }
  0xc9   : > { %630 = dma.done.wait (%p501_p5), %s397_s9, 128  }
  0xca   : > { %632 = vsyncadd (%p501_p5), %s397_s9, 4294967168  ;;  %s16_s19 = sadd.s32 1, %s663_s19   ;;  %s875_s12 = smov %s639_s13 }
  0xcb   : > { %p13_p6 = scmp.ge.s32.totalorder %s16_s19, 6   ;;  %s876_s13 = smov %s643_s14 }
  0xcc   : > { %s877_s14 = smov %s756_s30  ;;  %s878_s15 = smov %s655_s17 }
  0xcd   : > { %s879_s16 = smov %s659_s18  ;;  %s880_s17 = smov %s883_s22 }
  0xce   : > { %s881_s18 = smov %s887_s23  ;;  %15 = sbr.rel (!%p13_p6) target bundleno = 5 (0x5), region = 81 }
  0xd3   :  { %402 = vsyncpa [#allocation3], 1 }
  0xd4   :  { %404 = vsyncpa [#allocation3 + $0x1], 1 }

</bundles_post_ra>
